<compile_context>
chip_gen: v7x
topology: tpu7x:2x2x1
jax: 0.10.0
libtpu: 0.0.40
codegen_flags: <defaults>
</compile_context>

<pallas_src>
import functools

import jax
import jax.numpy as jnp
from jax import lax
from jax.experimental import pallas as pl
from jax.experimental.pallas import tpu as pltpu


# Packed-parameter buffer layout (rows x 128 lanes, f32, zero-padded):
#   rows  0:8   cols 0:4  -> W1  (8, 4)    [PyTorch weight layout: (out, in)]
#   rows  8:17  cols 0:8  -> W2  (9, 8)
#   rows 24:27  cols 0:9  -> W3  (3, 9)
#   rows 32:40  col  0    -> b1  (8,)
#   rows 32:41  col  1    -> b2  (9,)
#   rows 32:35  col  2    -> b3  (3,)
_P_ROWS = 48
_P_COLS = 128


def mlp_kernel(p_ref, x_ref, o_ref):
    x = x_ref[...]                 # (TB, 4)  natural layout, batch on sublanes

    # Weights/biases sliced from the resident packed buffer.
    w1 = p_ref[0:8, 0:4]           # (8, 4)
    w2 = p_ref[8:24, 0:8]          # (16, 8)   rows 9:16 zero
    w3 = p_ref[24:32, 0:16]        # (8, 16)   rows 3:8 / cols 9:16 zero
    b1 = p_ref[32:40, 0:1]         # (8, 1)
    b2 = p_ref[32:48, 1:2]         # (16, 1)   rows 9:16 zero
    b3 = p_ref[32:40, 2:3]         # (8, 1)    rows 3:8 zero

    # w1 @ x^T: contract the size-4 feature axes so the batch lands on the
    # lane axis on-chip (no HBM transpose of x anywhere).
    h1 = lax.dot_general(w1, x, (((1,), (1,)), ((), ())),
                         preferred_element_type=jnp.float32)          # (8, TB)
    h1 = jnp.maximum(h1 + b1, 0.0)
    # Zero-padded weight/bias rows keep padded hidden rows exactly zero
    # through the ReLUs, so they never contaminate the real logits.
    h2 = jnp.maximum(
        jnp.dot(w2, h1, preferred_element_type=jnp.float32) + b2, 0.0)  # (16, TB)
    o = jnp.dot(w3, h2, preferred_element_type=jnp.float32) + b3        # (8, TB)

    # Only the 3 real logit rows are written back (lane-dense, sublane-masked).
    o_ref[...] = o[0:3, :]


def pack_params(params):
    """Pack PyTorch-layout weights/biases into one (48, 128) f32 buffer."""
    w1, b1 = params["w1"], params["b1"]  # (8, 4), (8,)
    w2, b2 = params["w2"], params["b2"]  # (9, 8), (9,)
    w3, b3 = params["w3"], params["b3"]  # (3, 9), (3,)
    p = jnp.zeros((_P_ROWS, _P_COLS), jnp.float32)
    p = p.at[0:8, 0:4].set(w1.astype(jnp.float32))
    p = p.at[8:17, 0:8].set(w2.astype(jnp.float32))
    p = p.at[24:27, 0:9].set(w3.astype(jnp.float32))
    p = p.at[32:40, 0].set(b1.astype(jnp.float32))
    p = p.at[32:41, 1].set(b2.astype(jnp.float32))
    p = p.at[32:35, 2].set(b3.astype(jnp.float32))
    return p


@functools.partial(jax.jit, static_argnames=("block_b",))
def mlp_forward(x, packed_params, *, block_b=4096):
    """x: (B, 4) float array. packed_params: output of pack_params. Returns (B, 3)."""
    B = x.shape[0]
    block_b = max(128, 128 * (block_b // 128))      # lane-dense tile width
    b128 = 128 * pl.cdiv(B, 128)                    # minimal lane-padded batch
    tb = min(block_b, b128)
    if tb == b128 and b128 >= 256:
        # Prefer >=2 grid steps so both v7x TensorCores get work.
        tb = 128 * pl.cdiv(b128 // 128, 2)
    b_pad = tb * pl.cdiv(b128, tb)

    x = x.astype(jnp.float32)
    if b_pad != B:
        x = jnp.pad(x, ((0, b_pad - B), (0, 0)))    # zero-pad batch rows only

    out_t = pl.pallas_call(
        mlp_kernel,
        out_shape=jax.ShapeDtypeStruct((3, b_pad), jnp.float32),
        grid=(b_pad // tb,),
        in_specs=[
            # Packed params: constant index_map -> DMA'd once, resident in VMEM.
            pl.BlockSpec((_P_ROWS, _P_COLS), lambda i: (0, 0)),
            # Natural-layout x tile (last dim 4 == full array dim), pipelined.
            pl.BlockSpec((tb, 4), lambda i: (i, 0)),
        ],
        # Batch-on-lanes logits; only the 3 real rows ever touch HBM.
        out_specs=pl.BlockSpec((3, tb), lambda i: (0, i)),
        compiler_params=pltpu.CompilerParams(
            dimension_semantics=("parallel",),      # v7x megacore sharding
        ),
    )(packed_params, x)

    return out_t[:, :B].T  # single slice-transpose back to (B, 3)


def init_params(key, in_features=4, h1=8, h2=9, out_features=3):
    """nn.Linear-style init, PyTorch layout: W (out, in), b (out,)."""
    def linear(k, fan_in, fan_out):
        kw, kb = jax.random.split(k)
        bound = 1.0 / jnp.sqrt(jnp.float32(fan_in))
        w = jax.random.uniform(kw, (fan_out, fan_in), jnp.float32, -bound, bound)
        b = jax.random.uniform(kb, (fan_out,), jnp.float32, -bound, bound)
        return w, b

    k1, k2, k3 = jax.random.split(key, 3)
    w1, b1 = linear(k1, in_features, h1)
    w2, b2 = linear(k2, h1, h2)
    w3, b3 = linear(k3, h2, out_features)
    return {"w1": w1, "b1": b1, "w2": w2, "b2": b2, "w3": w3, "b3": b3}


def _reference(x, params):
    h1 = jnp.maximum(x @ params["w1"].T + params["b1"], 0.0)
    h2 = jnp.maximum(h1 @ params["w2"].T + params["b2"], 0.0)
    return h2 @ params["w3"].T + params["b3"]


if __name__ == "__main__":
    key = jax.random.PRNGKey(0)
    k_params, k_x, k_x2 = jax.random.split(key, 3)

    params = init_params(k_params)
    packed = pack_params(params)

    # Small Iris-like batch: (batch=8, in_features=4) -> single grid step.
    x = jax.random.normal(k_x, (8, 4), dtype=jnp.float32)
    out = mlp_forward(x, packed)
    jax.block_until_ready(out)
    assert out.shape == (8, 3)
    assert jnp.allclose(out, _reference(x, params), atol=1e-5, rtol=1e-5)

    # Multi-tile grid (>=2 steps for megacore) + ragged batch padding.
    x2 = jax.random.normal(k_x2, (300, 4), dtype=jnp.float32)
    out2 = mlp_forward(x2, packed)                 # b128=384 -> tb=256, grid=(2,)
    jax.block_until_ready(out2)
    assert out2.shape == (300, 3)
    assert jnp.allclose(out2, _reference(x2, params), atol=1e-5, rtol=1e-5)

    # Explicit small tile -> grid=(3,) path.
    out3 = mlp_forward(x2, packed, block_b=128)
    jax.block_until_ready(out3)
    assert jnp.allclose(out3, _reference(x2, params), atol=1e-5, rtol=1e-5)

    print("KERNEL_OK")
</pallas_src>

<mosaic_0001>
module attributes {stable_mosaic.version = 11 : i64} {
  func.func @mlp_kernel(%arg0: i32, %arg1: memref<48x128xf32, #tpu.memory_space<vmem>>, %arg2: memref<128x4xf32, #tpu.memory_space<vmem>>, %arg3: memref<3x128xf32, #tpu.memory_space<vmem>>) attributes {dimension_semantics = [#tpu.dimension_semantics<parallel>], iteration_bounds = array<i64: 1>, scalar_prefetch = 0 : i64, scratch_operands = 0 : i64, tpu.core_type = #tpu.core_type<tc>, window_params = [{pipeline_mode = #tpu.pipeline_mode<synchronous>, transform_indices = @transform_0, window_bounds = array<i64: 48, 128>}, {transform_indices = @transform_1, window_bounds = array<i64: 128, 4>}, {transform_indices = @transform_2, window_bounds = array<i64: 3, 128>}]} {
    %c0 = arith.constant 0 : index
    %c0_0 = arith.constant 0 : index
    %0 = vector.load %arg2[%c0, %c0_0] : memref<128x4xf32, #tpu.memory_space<vmem>>, vector<128x4xf32>
    %c0_1 = arith.constant 0 : index
    %c0_2 = arith.constant 0 : index
    %1 = vector.load %arg1[%c0_1, %c0_2] : memref<48x128xf32, #tpu.memory_space<vmem>>, vector<8x4xf32>
    %c8 = arith.constant 8 : index
    %c0_3 = arith.constant 0 : index
    %2 = vector.load %arg1[%c8, %c0_3] : memref<48x128xf32, #tpu.memory_space<vmem>>, vector<16x8xf32>
    %c24 = arith.constant 24 : index
    %c0_4 = arith.constant 0 : index
    %3 = vector.load %arg1[%c24, %c0_4] : memref<48x128xf32, #tpu.memory_space<vmem>>, vector<8x16xf32>
    %c32 = arith.constant 32 : index
    %c0_5 = arith.constant 0 : index
    %4 = vector.load %arg1[%c32, %c0_5] : memref<48x128xf32, #tpu.memory_space<vmem>>, vector<8x1xf32>
    %c32_6 = arith.constant 32 : index
    %c1 = arith.constant 1 : index
    %5 = vector.load %arg1[%c32_6, %c1] : memref<48x128xf32, #tpu.memory_space<vmem>>, vector<16x1xf32>
    %c32_7 = arith.constant 32 : index
    %c2 = arith.constant 2 : index
    %6 = vector.load %arg1[%c32_7, %c2] : memref<48x128xf32, #tpu.memory_space<vmem>>, vector<8x1xf32>
    %cst = arith.constant dense<0.000000e+00> : vector<8x128xf32>
    %7 = tpu.matmul %1, %0, %cst {dimension_numbers = #tpu.dot_dimension_numbers<[1], [1], [0], [0], [0, 0, 1, 0], [], []>} : vector<8x4xf32>, vector<128x4xf32>, vector<8x128xf32> -> vector<8x128xf32>
    %8 = vector.broadcast %4 : vector<8x1xf32> to vector<8x128xf32>
    %9 = arith.addf %7, %8 : vector<8x128xf32>
    %cst_8 = arith.constant 0.000000e+00 : f32
    %10 = vector.broadcast %cst_8 : f32 to vector<8x128xf32>
    %11 = arith.maximumf %9, %10 : vector<8x128xf32>
    %cst_9 = arith.constant dense<0.000000e+00> : vector<16x128xf32>
    %12 = tpu.matmul %2, %11, %cst_9 {dimension_numbers = #tpu.dot_dimension_numbers<[1], [0], [0], [1], [0, 0, 1, 1], [], []>} : vector<16x8xf32>, vector<8x128xf32>, vector<16x128xf32> -> vector<16x128xf32>
    %13 = vector.broadcast %5 : vector<16x1xf32> to vector<16x128xf32>
    %14 = arith.addf %12, %13 : vector<16x128xf32>
    %cst_10 = arith.constant 0.000000e+00 : f32
    %15 = vector.broadcast %cst_10 : f32 to vector<16x128xf32>
    %16 = arith.maximumf %14, %15 : vector<16x128xf32>
    %cst_11 = arith.constant dense<0.000000e+00> : vector<8x128xf32>
    %17 = tpu.matmul %3, %16, %cst_11 {dimension_numbers = #tpu.dot_dimension_numbers<[1], [0], [0], [1], [0, 0, 1, 1], [], []>} : vector<8x16xf32>, vector<16x128xf32>, vector<8x128xf32> -> vector<8x128xf32>
    %18 = vector.broadcast %6 : vector<8x1xf32> to vector<8x128xf32>
    %19 = arith.addf %17, %18 : vector<8x128xf32>
    %20 = vector.extract_strided_slice %19 {offsets = [0, 0], sizes = [3, 128], strides = [1, 1]} : vector<8x128xf32> to vector<3x128xf32>
    %c0_12 = arith.constant 0 : index
    %c0_13 = arith.constant 0 : index
    %21 = vector.load %arg3[%c0_12, %c0_13] : memref<3x128xf32, #tpu.memory_space<vmem>>, vector<3x128xf32>
    tpu.vector_store %arg3[%c0_12, %c0_13], %20 {strides = array<i32>} : memref<3x128xf32, #tpu.memory_space<vmem>>, vector<3x128xf32>,
    return
  }
  func.func @transform_0(%arg0: i32) -> (i32, i32) {
    %c0_i32 = arith.constant 0 : i32
    %c0_i32_0 = arith.constant 0 : i32
    %c0_i32_1 = arith.constant 0 : i32
    return %c0_i32, %c0_i32_0 : i32, i32
  }
  func.func @transform_1(%arg0: i32) -> (i32, i32) {
    %c0_i32 = arith.constant 0 : i32
    %c0_i32_0 = arith.constant 0 : i32
    return %arg0, %c0_i32 : i32, i32
  }
  func.func @transform_2(%arg0: i32) -> (i32, i32) {
    %c0_i32 = arith.constant 0 : i32
    %c0_i32_0 = arith.constant 0 : i32
    return %c0_i32, %arg0 : i32, i32
  }
}

</mosaic_0001>

<bundles_post_ra>
// kernel: mlp_forward.1
= control target key start
LH: loop header
LB: loop body
LE: loop exit
PB: predicated region body
PF: predicated region fallthrough
CT: control target
= control target key end

     0   :  { %vm39_vm0 = vcmask 31744   ;;  %v475_v0 = vmov 0.0|0.0   ;;  %vm476_vm2 = vmmov 0   ;;  %v477_v4 = vmov 0.0   ;;  %s603_s1 = inlined_call_operand.vmem [shape: f32[128,4], index: 1, kind: input, shape index: {}]   ;;  %s604_s0 = inlined_call_operand.vmem [shape: f32[48,128], index: 0, kind: input, shape index: {}]   ;;  %s605_s2 = inlined_call_operand.vmem [shape: f32[3,128], index: 2, kind: output, shape index: {}]  }
   0x1   :  { %429 = vmatprep.subr.bf16.mxu0 %v475_v0  ;;  %v11_v1 = vld [vmem:[%s603_s1] sm:$0xff]  ;;  %v12_v2 = vld [vmem:[%s603_s1 + $0x8] sm:$0xff]  ;;  %vm505_vm1 = vmpackc.low %vm39_vm0, %vm39_vm0  ;;  %414 = vmatprep.mubr.msk.f32.mxu0 %vm476_vm2, %v477_v4  ;;  %v478_v6 = vmov 0   ;;  %vm172_vm3 = vcmask 64512   ;;  %v479_v32 = vmov 1   ;;  %v480_v39 = vmov 2  }
   0x2   :  { %v430_v5 = vpack.c.bf16 %v12_v2, %v11_v1  ;;  %470 = vset.pattern.permute.xlu0 %v478_v6  ;;  %v13_v7 = vld [vmem:[%s603_s1 + $0x10] sm:$0xff]  ;;  %v14_v8 = vld [vmem:[%s603_s1 + $0x18] sm:$0xff]  ;;  %v31_v9 = vld [vmem:[%s604_s0 + $0x20] sm:$0xff]  ;;  %472 = vset.pattern.permute.xlu1 %v479_v32  ;;  %vm260_vm4 = vcmask 130048  }
   0x3   :  { %v434_v10 = vpack.c.bf16 %v14_v8, %v13_v7  ;;  %36 = vperm.xlu0 %470, %v31_v9   ;;  %v15_v11 = vld [vmem:[%s603_s1 + $0x20] sm:$0xff]  ;;  %v16_v12 = vld [vmem:[%s603_s1 + $0x28] sm:$0xff]  ;;  %v17_v14 = vld [vmem:[%s603_s1 + $0x30] sm:$0xff] }
   0x4   :  { %432 = vmatpush3.bf16.xpose.msk.msra.mxu0 %vm505_vm1, %v430_v5  ;;  %v438_v13 = vpack.c.bf16 %v16_v12, %v15_v11  ;;  %v18_v15 = vld [vmem:[%s603_s1 + $0x38] sm:$0xff]  ;;  %v19_v17 = vld [vmem:[%s603_s1 + $0x40] sm:$0xff]  ;;  %v20_v18 = vld [vmem:[%s603_s1 + $0x48] sm:$0xff] }
   0x5   :  { %433 = vmatprep.subr.bf16.mxu0 %v475_v0  ;;  %v442_v16 = vpack.c.bf16 %v18_v15, %v17_v14  ;;  %v446_v19 = vpack.c.bf16 %v20_v18, %v19_v17  ;;  %v21_v20 = vld [vmem:[%s603_s1 + $0x50] sm:$0xff]  ;;  %v22_v21 = vld [vmem:[%s603_s1 + $0x58] sm:$0xff]  ;;  %v23_v23 = vld [vmem:[%s603_s1 + $0x60] sm:$0xff] }
   0x6   :  { %v450_v22 = vpack.c.bf16 %v22_v21, %v21_v20  ;;  %v24_v24 = vld [vmem:[%s603_s1 + $0x68] sm:$0xff]  ;;  %v25_v26 = vld [vmem:[%s603_s1 + $0x70] sm:$0xff]  ;;  %v26_v27 = vld [vmem:[%s603_s1 + $0x78] sm:$0xff] }
   0x7   :  { %v454_v25 = vpack.c.bf16 %v24_v24, %v23_v23  ;;  %v458_v28 = vpack.c.bf16 %v26_v27, %v25_v26  ;;  %v27_v29 = vld [vmem:[%s604_s0] sm:$0xff]  ;;  %v28_v30 = vld [vmem:[%s604_s0 + $0x8] sm:$0xff]  ;;  %471 = vset.pattern.permute.xlu0 %v479_v32  ;;  %v29_v38 = vld [vmem:[%s604_s0 + $0x10] sm:$0xff] }
   0x8   :  { %419 = vmatprep.mubr.msk.f32.mxu1 %vm172_vm3, %v28_v30  ;;  %v33_v31 = vld [vmem:[%s604_s0 + $0x28] sm:$0xff]  ;;  %164 = vperm.xlu0 %471, %v31_v9   ;;  %v30_v49 = vld [vmem:[%s604_s0 + $0x18] sm:$0xff] }
   0x9   :  { %169 = vperm.xlu1 %472, %v33_v31  }
   0xc   :  { %436 = vmatpush3.bf16.xpose.msk.msra.mxu0 %vm505_vm1, %v434_v10  ;;  %474 = vset.pattern.permute.xlu0 %v480_v39 }
   0xd   :  { %437 = vmatprep.subr.bf16.mxu0 %v475_v0  ;;  %473 = vset.pattern.permute.xlu1 %v480_v39 }
   0xe   :  { %257 = vperm.xlu1 %473, %v31_v9  }
  0x14   :  { %440 = vmatpush3.bf16.xpose.msk.msra.mxu0 %vm505_vm1, %v438_v13 }
  0x15   :  { %441 = vmatprep.subr.bf16.mxu0 %v475_v0 }
  0x1c   :  { %444 = vmatpush3.bf16.xpose.msk.msra.mxu0 %vm505_vm1, %v442_v16 }
  0x1d   :  { %445 = vmatprep.subr.bf16.mxu0 %v475_v0 }
  0x24   :  { %448 = vmatpush3.bf16.xpose.msk.msra.mxu0 %vm505_vm1, %v446_v19 }
  0x25   :  { %449 = vmatprep.subr.bf16.mxu0 %v475_v0 }
  0x2c   :  { %452 = vmatpush3.bf16.xpose.msk.msra.mxu0 %vm505_vm1, %v450_v22 }
  0x2d   :  { %453 = vmatprep.subr.bf16.mxu0 %v475_v0 }
  0x34   :  { %456 = vmatpush3.bf16.xpose.msk.msra.mxu0 %vm505_vm1, %v454_v25 }
  0x35   :  { %457 = vmatprep.subr.bf16.mxu0 %v475_v0 }
  0x3c   :  { %460 = vmatpush3.bf16.xpose.msk.msra.mxu0 %vm505_vm1, %v458_v28 }
  0x43   :  { %415 = vmatmul.mubr.msk.f32.vlgmr.msra.gmra.mrb[0].mxu0 %vm39_vm0, %v27_v29 }
  0x82   :  { %v37_v33 = vpop.permute.xlu0 %36 }
  0x87   :  { %v165_v41 = vpop.permute.xlu0 %164 }
  0x88   :  { %v170_v40 = vpop.permute.xlu1 %169 }
  0x8d   :  { %v258_v50 = vpop.permute.xlu1 %257 }
 0x116   :  { %v157_v34 = vpop.f32.mrb[0].mxu0 }
 0x117   :  { %v158_v35 = vadd.f32 %v157_v34, %v37_v33  ;;  %v416_v36 = vpop.f32.mrb[1].mxu0 }
 0x119   :  { %v161_v37 = vmax.f32 %v158_v35, 0.0 }
 0x11b   :  { %417 = vmatprep.subr.mxu1 %v161_v37 }
 0x11c   :  { %418 = vmatpush3.msra.mxu1 %v161_v37 }
 0x11d   :  { %420 = vmatmul.mubr.msk.f32.vlgmr.msra.gmra.mrb[0].mxu1 %vm172_vm3, %v29_v38  ;;  %461 = vmatprep.subr.bf16.mxu1 %v475_v0 }
 0x11e   :  { %426 = vmatprep.mubr.msk.f32.mxu1 %vm476_vm2, %v477_v4 }
 0x1f0   :  { %v421_v42 = vpop.f32.mrb[0].mxu1 }
 0x1f1   :  { %v251_v43 = vadd.f32 %v421_v42, %v170_v40  ;;  %v245_v44 = vpop.f32.mrb[1].mxu1 }
 0x1f2   :  { %v246_v45 = vadd.f32 %v245_v44, %v165_v41 }
 0x1f3   :  { %v255_v46 = vmax.f32 %v251_v43, 0.0 }
 0x1f4   :  { %v254_v47 = vmax.f32 %v246_v45, 0.0 }
 0x1f6   :  { %v462_v48 = vpack.c.bf16 %v255_v46, %v254_v47 }
 0x1f8   :  { %463 = vmatpush3.bf16.msra.mxu1 %v462_v48 }
 0x1fb   :  { %427 = vmatmul.mubr.msk.f32.vlgmr.msra.gmra.mrb[2].mxu1 %vm260_vm4, %v30_v49 }
 0x2ce   :  { %v330_v51 = vpop.f32.mrb[2].mxu1 }
 0x2cf   :  { %v331_v52 = vadd.f32 %v330_v51, %v258_v50  ;;  %v428_v53 = vpop.f32.mrb[3].mxu1 }
 0x2d1   :  { %334 = vst [vmem:[%s605_s2] sm:$0x7] %v331_v52 }

</bundles_post_ra>
